<compile_context>
chip_gen: v7x
topology: tpu7x:2x2x1
jax: 0.10.0
libtpu: 0.0.40
codegen_flags: <defaults>
</compile_context>

<pallas_src>
import math
import functools

import jax
import jax.numpy as jnp
from jax.experimental import pallas as pl
from jax.experimental.pallas import tpu as pltpu


# ---------------------------------------------------------------------------
# Problem configuration (small, consistent with the module's __init__)
# ---------------------------------------------------------------------------
BATCH = 2
CHANNELS = 1
IMG_SIZE = 16
IMG_SHAPE = (CHANNELS, IMG_SIZE, IMG_SIZE)
IN_FEATURES = int(CHANNELS * IMG_SIZE * IMG_SIZE)             # 256
NEURON_COMPLEXITY = int(math.sqrt(IMG_SIZE) // 1)             # 4
H1 = int(10 * NEURON_COMPLEXITY)                              # 40
H2 = int(5 * NEURON_COMPLEXITY)                               # 20
OUT = 1

_TB_CAP = 2048          # max batch rows per grid step (fits every chip's VMEM)


def _round_up(x, m):
    return ((x + m - 1) // m) * m


def _pick_tb(b_pad):
    """Rows per grid step.  b_pad is a multiple of 8."""
    if b_pad <= 8:
        return b_pad
    # Keep >= 2 grid steps so the "parallel" batch axis gives v7x megacore
    # something to split, while capping the tile for VMEM headroom everywhere
    # (v7x has only 64 MiB physical VMEM).
    half = _round_up((b_pad + 1) // 2, 8)
    return int(min(_TB_CAP, half))


# ---------------------------------------------------------------------------
# Kernel: the full 3-layer MLP for one batch tile.  Layers 1/2 hit the MXU,
# LeakyReLU runs on the VPU, layer 3 is a (1,H2)x(TB,H2)^T contraction whose
# result is already lane-major, sigmoid uses the EUP (exp) + a divide.
# ---------------------------------------------------------------------------
def _discriminator_kernel(x_ref, w1_ref, b1_ref, w2_ref, b2_ref, w3t_ref,
                          b3_ref, o_ref):
    x = x_ref[...]                                                  # (TB, IN)

    # Layer 1: Linear + LeakyReLU(0.2)
    h = jnp.dot(x, w1_ref[...], preferred_element_type=jnp.float32) + b1_ref[...]
    h = jnp.where(h > 0, h, 0.2 * h)

    # Layer 2: Linear + LeakyReLU(0.2)
    h = jnp.dot(h, w2_ref[...], preferred_element_type=jnp.float32) + b2_ref[...]
    h = jnp.where(h > 0, h, 0.2 * h)                                # (TB, H2)

    # Layer 3: single output neuron.  Contract over H2 with the weight row on
    # the left so the result lands lane-major as (1, TB) -> packed output row.
    logits = jax.lax.dot_general(
        w3t_ref[...], h, (((1,), (1,)), ((), ())),
        preferred_element_type=jnp.float32) + b3_ref[0, 0]          # (1, TB)
    val = 1.0 / (1.0 + jnp.exp(-logits))                            # sigmoid

    o_ref[...] = val.reshape(o_ref.shape).astype(o_ref.dtype)       # (1, 1, TB)


@functools.partial(jax.jit, static_argnames=("tb",))
def _run(x_pad, w1, b1, w2, b2, w3t, b3, *, tb):
    b_pad = x_pad.shape[0]
    num_tiles = -(-b_pad // tb)            # ceil; last input tile may be ragged

    in_specs = [
        # Activations stream one batch tile per grid step.
        pl.BlockSpec((tb, IN_FEATURES), lambda i: (i, 0)),
        # Weights / biases: constant index_map -> fetched once, stay resident.
        pl.BlockSpec((IN_FEATURES, H1), lambda i: (0, 0)),
        pl.BlockSpec((1, H1),           lambda i: (0, 0)),
        pl.BlockSpec((H1, H2),          lambda i: (0, 0)),
        pl.BlockSpec((1, H2),           lambda i: (0, 0)),
        pl.BlockSpec((1, H2),           lambda i: (0, 0)),
        # Final bias as an SMEM scalar.
        pl.BlockSpec(memory_space=pltpu.MemorySpace.SMEM),
    ]
    # Packed, lane-dense output: one (1, 1, tb) row of validities per tile
    # (contiguous tb*4 bytes in HBM, no broadcast amplification).
    out_specs = pl.BlockSpec((1, 1, tb), lambda i: (i, 0, 0))
    out_shape = jax.ShapeDtypeStruct((num_tiles, 1, tb), jnp.float32)

    return pl.pallas_call(
        _discriminator_kernel,
        out_shape=out_shape,
        grid=(num_tiles,),
        in_specs=in_specs,
        out_specs=out_specs,
        compiler_params=pltpu.CompilerParams(
            dimension_semantics=("parallel",),       # megacore on v7x
            vmem_limit_bytes=32 * 1024 * 1024,       # safe on v5e/v6e/v7x
        ),
    )(x_pad, w1, b1, w2, b2, w3t, b3)


def discriminator_forward(img, w1, b1, w2, b2, w3, b3):
    """img: (B, C, H, W) float32 -> validity: (B, 1) float32."""
    b = img.shape[0]
    x = img.reshape(b, -1).astype(jnp.float32)                      # (B, C*H*W)

    # Pad only to a sublane multiple of 8 (cheap).  Any remaining raggedness of
    # the last batch tile is handled by Pallas' bounded block reads (rows are
    # independent), so we never pad the whole tensor to a multiple of tb.
    b_pad = _round_up(b, 8)
    if b_pad != b:
        x = jnp.pad(x, ((0, b_pad - b), (0, 0)))

    tb = _pick_tb(b_pad)
    w3t = jnp.reshape(w3, (1, H2))                                  # (1, H2) row
    b3s = jnp.reshape(b3, (1, 1)).astype(jnp.float32)

    out = _run(x, w1, b1, w2, b2, w3t, b3s, tb=tb)                  # (nt, 1, tb)
    return out.reshape(-1, 1)[:b]


# ---------------------------------------------------------------------------
# Deterministic parameter init (mirrors torch.nn.Linear default: U(-k, k),
# k = 1/sqrt(fan_in)).  Weights stored as (in_features, out_features).
# ---------------------------------------------------------------------------
def init_params(key):
    def linear(key, fan_in, fan_out):
        k = 1.0 / math.sqrt(fan_in)
        kw, kb = jax.random.split(key)
        w = jax.random.uniform(kw, (fan_in, fan_out), jnp.float32, -k, k)
        b = jax.random.uniform(kb, (1, fan_out), jnp.float32, -k, k)
        return w, b

    k1, k2, k3 = jax.random.split(key, 3)
    w1, b1 = linear(k1, IN_FEATURES, H1)
    w2, b2 = linear(k2, H1, H2)
    w3, b3 = linear(k3, H2, OUT)
    return w1, b1, w2, b2, w3, b3


def _reference_forward(img, w1, b1, w2, b2, w3, b3):
    x = img.reshape(img.shape[0], -1)
    h = x @ w1 + b1
    h = jnp.where(h > 0, h, 0.2 * h)
    h = h @ w2 + b2
    h = jnp.where(h > 0, h, 0.2 * h)
    return jax.nn.sigmoid(h @ w3 + b3)


def _check(img, params, atol=2e-3):
    # Tolerance covers MXU default-precision (bf16-pass) differences between
    # the XLA reference matmuls and the in-kernel matmuls; outputs are
    # sigmoid-bounded in (0, 1), so an absolute 2e-3 check is still meaningful.
    got = jax.block_until_ready(discriminator_forward(img, *params))
    ref = _reference_forward(img, *params)
    assert got.shape == (img.shape[0], OUT), got.shape
    assert jnp.allclose(got, ref, atol=atol, rtol=2e-3), (
        f"Pallas output mismatch vs reference (batch={img.shape[0]})")
    return got


if __name__ == "__main__":
    key = jax.random.PRNGKey(0)
    k_img, k_params, k_mid, k_big = jax.random.split(key, 4)

    params = init_params(k_params)

    # Small shape consistent with the module (batch=2, channels=1, img_size=16).
    img = jax.random.normal(k_img, (BATCH,) + IMG_SHAPE, jnp.float32)
    _check(img, params)

    # Batch not a multiple of 8: exercises the pad-to-8 path (tb=152, grid=2).
    mid = jax.random.normal(k_mid, (300,) + IMG_SHAPE, jnp.float32)
    _check(mid, params)

    # Larger batch: multiple grid steps, weights stay resident (tb=256, grid=2).
    big = jax.random.normal(k_big, (512,) + IMG_SHAPE, jnp.float32)
    _check(big, params)

    print("KERNEL_OK")
</pallas_src>

<mosaic_0001>
module attributes {stable_mosaic.version = 11 : i64} {
  func.func @_discriminator_kernel(%arg0: i32, %arg1: memref<8x256xf32, #tpu.memory_space<vmem>>, %arg2: memref<256x40xf32, #tpu.memory_space<vmem>>, %arg3: memref<1x40xf32, #tpu.memory_space<vmem>>, %arg4: memref<40x20xf32, #tpu.memory_space<vmem>>, %arg5: memref<1x20xf32, #tpu.memory_space<vmem>>, %arg6: memref<1x20xf32, #tpu.memory_space<vmem>>, %arg7: memref<1x1xf32, #tpu.memory_space<smem>>, %arg8: memref<1x1x8xf32, #tpu.memory_space<vmem>>) attributes {dimension_semantics = [#tpu.dimension_semantics<parallel>], iteration_bounds = array<i64: 1>, scalar_prefetch = 0 : i64, scratch_operands = 0 : i64, tpu.core_type = #tpu.core_type<tc>, window_params = [{transform_indices = @transform_0, window_bounds = array<i64: 8, 256>}, {pipeline_mode = #tpu.pipeline_mode<synchronous>, transform_indices = @transform_1, window_bounds = array<i64: 256, 40>}, {pipeline_mode = #tpu.pipeline_mode<synchronous>, transform_indices = @transform_2, window_bounds = array<i64: 1, 40>}, {pipeline_mode = #tpu.pipeline_mode<synchronous>, transform_indices = @transform_3, window_bounds = array<i64: 40, 20>}, {pipeline_mode = #tpu.pipeline_mode<synchronous>, transform_indices = @transform_4, window_bounds = array<i64: 1, 20>}, {pipeline_mode = #tpu.pipeline_mode<synchronous>, transform_indices = @transform_5, window_bounds = array<i64: 1, 20>}, {transform_indices = @transform_6, window_bounds = array<i64: 1, 1>}, {transform_indices = @transform_7, window_bounds = array<i64: 1, 1, 8>}]} {
    %c0 = arith.constant 0 : index
    %c0_0 = arith.constant 0 : index
    %0 = vector.load %arg1[%c0, %c0_0] : memref<8x256xf32, #tpu.memory_space<vmem>>, vector<8x256xf32>
    %c0_1 = arith.constant 0 : index
    %c0_2 = arith.constant 0 : index
    %1 = vector.load %arg2[%c0_1, %c0_2] : memref<256x40xf32, #tpu.memory_space<vmem>>, vector<256x40xf32>
    %cst = arith.constant dense<0.000000e+00> : vector<8x40xf32>
    %2 = tpu.matmul %0, %1, %cst {dimension_numbers = #tpu.dot_dimension_numbers<[1], [0], [0], [1], [0, 0, 1, 1], [], []>} : vector<8x256xf32>, vector<256x40xf32>, vector<8x40xf32> -> vector<8x40xf32>
    %c0_3 = arith.constant 0 : index
    %c0_4 = arith.constant 0 : index
    %3 = vector.load %arg3[%c0_3, %c0_4] : memref<1x40xf32, #tpu.memory_space<vmem>>, vector<1x40xf32>
    %4 = vector.broadcast %3 : vector<1x40xf32> to vector<8x40xf32>
    %5 = arith.addf %2, %4 : vector<8x40xf32>
    %cst_5 = arith.constant 0.000000e+00 : f32
    %6 = vector.broadcast %cst_5 : f32 to vector<8x40xf32>
    %7 = arith.cmpf ogt, %5, %6 : vector<8x40xf32>
    %cst_6 = arith.constant 2.000000e-01 : f32
    %8 = vector.broadcast %cst_6 : f32 to vector<8x40xf32>
    %9 = arith.mulf %8, %5 : vector<8x40xf32>
    %10 = arith.select %7, %5, %9 : vector<8x40xi1>, vector<8x40xf32>
    %c0_7 = arith.constant 0 : index
    %c0_8 = arith.constant 0 : index
    %11 = vector.load %arg4[%c0_7, %c0_8] : memref<40x20xf32, #tpu.memory_space<vmem>>, vector<40x20xf32>
    %cst_9 = arith.constant dense<0.000000e+00> : vector<8x20xf32>
    %12 = tpu.matmul %10, %11, %cst_9 {dimension_numbers = #tpu.dot_dimension_numbers<[1], [0], [0], [1], [0, 0, 1, 1], [], []>} : vector<8x40xf32>, vector<40x20xf32>, vector<8x20xf32> -> vector<8x20xf32>
    %c0_10 = arith.constant 0 : index
    %c0_11 = arith.constant 0 : index
    %13 = vector.load %arg5[%c0_10, %c0_11] : memref<1x20xf32, #tpu.memory_space<vmem>>, vector<1x20xf32>
    %14 = vector.broadcast %13 : vector<1x20xf32> to vector<8x20xf32>
    %15 = arith.addf %12, %14 : vector<8x20xf32>
    %cst_12 = arith.constant 0.000000e+00 : f32
    %16 = vector.broadcast %cst_12 : f32 to vector<8x20xf32>
    %17 = arith.cmpf ogt, %15, %16 : vector<8x20xf32>
    %cst_13 = arith.constant 2.000000e-01 : f32
    %18 = vector.broadcast %cst_13 : f32 to vector<8x20xf32>
    %19 = arith.mulf %18, %15 : vector<8x20xf32>
    %20 = arith.select %17, %15, %19 : vector<8x20xi1>, vector<8x20xf32>
    %c0_14 = arith.constant 0 : index
    %c0_15 = arith.constant 0 : index
    %21 = vector.load %arg6[%c0_14, %c0_15] : memref<1x20xf32, #tpu.memory_space<vmem>>, vector<1x20xf32>
    %cst_16 = arith.constant dense<0.000000e+00> : vector<1x8xf32>
    %22 = tpu.matmul %21, %20, %cst_16 {dimension_numbers = #tpu.dot_dimension_numbers<[1], [1], [0], [0], [0, 0, 1, 0], [], []>} : vector<1x20xf32>, vector<8x20xf32>, vector<1x8xf32> -> vector<1x8xf32>
    %c0_17 = arith.constant 0 : index
    %c0_18 = arith.constant 0 : index
    %23 = memref.load %arg7[%c0_17, %c0_18] : memref<1x1xf32, #tpu.memory_space<smem>>
    %24 = vector.broadcast %23 : f32 to vector<1x8xf32>
    %25 = arith.addf %22, %24 : vector<1x8xf32>
    %cst_19 = arith.constant 0.000000e+00 : f32
    %26 = vector.broadcast %cst_19 : f32 to vector<1x8xf32>
    %27 = arith.subf %26, %25 : vector<1x8xf32>
    %28 = math.exp %27 : vector<1x8xf32>
    %cst_20 = arith.constant 1.000000e+00 : f32
    %29 = vector.broadcast %cst_20 : f32 to vector<1x8xf32>
    %30 = arith.addf %29, %28 : vector<1x8xf32>
    %cst_21 = arith.constant 1.000000e+00 : f32
    %31 = vector.broadcast %cst_21 : f32 to vector<1x8xf32>
    %32 = arith.divf %31, %30 : vector<1x8xf32>
    %33 = vector.shape_cast %32 : vector<1x8xf32> to vector<1x1x8xf32>
    %c0_22 = arith.constant 0 : index
    %c0_23 = arith.constant 0 : index
    %c0_24 = arith.constant 0 : index
    %34 = vector.load %arg8[%c0_22, %c0_23, %c0_24] : memref<1x1x8xf32, #tpu.memory_space<vmem>>, vector<1x1x8xf32>
    tpu.vector_store %arg8[%c0_22, %c0_23, %c0_24], %33 {strides = array<i32>} : memref<1x1x8xf32, #tpu.memory_space<vmem>>, vector<1x1x8xf32>,
    return
  }
  func.func @transform_0(%arg0: i32) -> (i32, i32) {
    %c0_i32 = arith.constant 0 : i32
    %c0_i32_0 = arith.constant 0 : i32
    return %arg0, %c0_i32 : i32, i32
  }
  func.func @transform_1(%arg0: i32) -> (i32, i32) {
    %c0_i32 = arith.constant 0 : i32
    %c0_i32_0 = arith.constant 0 : i32
    %c0_i32_1 = arith.constant 0 : i32
    return %c0_i32, %c0_i32_0 : i32, i32
  }
  func.func @transform_2(%arg0: i32) -> (i32, i32) {
    %c0_i32 = arith.constant 0 : i32
    %c0_i32_0 = arith.constant 0 : i32
    %c0_i32_1 = arith.constant 0 : i32
    return %c0_i32, %c0_i32_0 : i32, i32
  }
  func.func @transform_3(%arg0: i32) -> (i32, i32) {
    %c0_i32 = arith.constant 0 : i32
    %c0_i32_0 = arith.constant 0 : i32
    %c0_i32_1 = arith.constant 0 : i32
    return %c0_i32, %c0_i32_0 : i32, i32
  }
  func.func @transform_4(%arg0: i32) -> (i32, i32) {
    %c0_i32 = arith.constant 0 : i32
    %c0_i32_0 = arith.constant 0 : i32
    %c0_i32_1 = arith.constant 0 : i32
    return %c0_i32, %c0_i32_0 : i32, i32
  }
  func.func @transform_5(%arg0: i32) -> (i32, i32) {
    %c0_i32 = arith.constant 0 : i32
    %c0_i32_0 = arith.constant 0 : i32
    %c0_i32_1 = arith.constant 0 : i32
    return %c0_i32, %c0_i32_0 : i32, i32
  }
  func.func @transform_6(%arg0: i32) -> (i32, i32) {
    %c0_i32 = arith.constant 0 : i32
    %c0_i32_0 = arith.constant 0 : i32
    %c0_i32_1 = arith.constant 0 : i32
    return %c0_i32, %c0_i32_0 : i32, i32
  }
  func.func @transform_7(%arg0: i32) -> (i32, i32, i32) {
    %c0_i32 = arith.constant 0 : i32
    %c0_i32_0 = arith.constant 0 : i32
    %c0_i32_1 = arith.constant 0 : i32
    return %arg0, %c0_i32, %c0_i32_0 : i32, i32, i32
  }
}

</mosaic_0001>

<bundles_post_ra>
// kernel: _run.1
= control target key start
LH: loop header
LB: loop body
LE: loop exit
PB: predicated region body
PF: predicated region fallthrough
CT: control target
= control target key end

     0   :  { %v469_v7 = vmov 0.0|0.0   ;;  %s656_s0 = inlined_call_operand.vmem [shape: f32[8,256], index: 0, kind: input, shape index: {}]   ;;  %s657_s1 = inlined_call_operand.vmem [shape: f32[256,40], index: 1, kind: input, shape index: {}]   ;;  %s658_s2 = inlined_call_operand.vmem [shape: f32[1,40], index: 2, kind: input, shape index: {}]   ;;  %s659_s3 = inlined_call_operand.vmem [shape: f32[40,20], index: 3, kind: input, shape index: {}]   ;;  %s660_s4 = inlined_call_operand.vmem [shape: f32[1,20], index: 4, kind: input, shape index: {}]   ;;  %s661_s5 = inlined_call_operand.vmem [shape: f32[1,20], index: 5, kind: input, shape index: {}]   ;;  %s662_s6 = inlined_call_operand.<no memory space> [shape: f32[1,1], index: 6, kind: input, shape index: {}]   ;;  %s663_s7 = inlined_call_operand.hbm [shape: f32[1,1,8], index: 7, kind: output, shape index: {}]  }
   0x1   :  { %v46_v0 = vld [vmem:[%s657_s1 + $0x80] sm:$0xff]  ;;  %v47_v1 = vld [vmem:[%s657_s1 + $0x88] sm:$0xff]  ;;  %v48_v5 = vld [vmem:[%s657_s1 + $0x90] sm:$0xff]  ;;  %431 = vmatprep.subr.bf16.mxu1 %v469_v7 }
   0x2   :  { %v30_v2 = vld [vmem:[%s657_s1] sm:$0xff]  ;;  %v399_v3 = vpack.c.bf16 %v47_v1, %v46_v0  ;;  %v31_v4 = vld [vmem:[%s657_s1 + $0x8] sm:$0xff]  ;;  %v49_v6 = vld [vmem:[%s657_s1 + $0x98] sm:$0xff] }
   0x3   :  { %v401_v8 = vpack.c.bf16 %v31_v4, %v30_v2  ;;  %v403_v9 = vpack.c.bf16 %v49_v6, %v48_v5  ;;  %v32_v10 = vld [vmem:[%s657_s1 + $0x10] sm:$0xff]  ;;  %v33_v11 = vld [vmem:[%s657_s1 + $0x18] sm:$0xff]  ;;  %v50_v12 = vld [vmem:[%s657_s1 + $0xa0] sm:$0xff] }
   0x4   :  { %400 = vmatprep.subr.bf16.mxu0 %v399_v3  ;;  %v51_v13 = vld [vmem:[%s657_s1 + $0xa8] sm:$0xff]  ;;  %v405_v14 = vpack.c.bf16 %v33_v11, %v32_v10  ;;  %v34_v16 = vld [vmem:[%s657_s1 + $0x20] sm:$0xff]  ;;  %v52_v18 = vld [vmem:[%s657_s1 + $0xb0] sm:$0xff] }
   0x5   :  { %402 = vmatpush3.bf16.msra.mxu0 %v401_v8  ;;  %v407_v15 = vpack.c.bf16 %v51_v13, %v50_v12  ;;  %v35_v17 = vld [vmem:[%s657_s1 + $0x28] sm:$0xff]  ;;  %v53_v19 = vld [vmem:[%s657_s1 + $0xb8] sm:$0xff]  ;;  %v36_v22 = vld [vmem:[%s657_s1 + $0x30] sm:$0xff] }
   0x6   :  { %404 = vmatprep.subr.bf16.mxu0 %v403_v9  ;;  %v409_v20 = vpack.c.bf16 %v35_v17, %v34_v16  ;;  %v411_v21 = vpack.c.bf16 %v53_v19, %v52_v18  ;;  %v37_v23 = vld [vmem:[%s657_s1 + $0x38] sm:$0xff]  ;;  %v54_v24 = vld [vmem:[%s657_s1 + $0xc0] sm:$0xff]  ;;  %v55_v25 = vld [vmem:[%s657_s1 + $0xc8] sm:$0xff] }
   0x7   :  { %v29_v26 = vld [vmem:[%s656_s0 + $0x8] sm:$0xff] }
   0x8   :  { %133 = vmatprep.mubr.f32.mxu0 %v29_v26 }
   0x9   :  { %406 = vmatpush3.bf16.msra.mxu0 %v405_v14 }
   0xa   :  { %408 = vmatprep.subr.bf16.mxu0 %v407_v15 }
   0xb   :  { %13 = vsyncpa [#allocation4], 0  ;;  %v413_v27 = vpack.c.bf16 %v37_v23, %v36_v22  ;;  %v415_v28 = vpack.c.bf16 %v55_v25, %v54_v24  ;;  %v38_v29 = vld [vmem:[%s657_s1 + $0x40] sm:$0xff]  ;;  %v39_v30 = vld [vmem:[%s657_s1 + $0x48] sm:$0xff]  ;;  %v470_v58 = vmov 0.0   ;;  %vm471_vm0 = vmmov 0  }
   0xc   :  { %v56_v31 = vld [vmem:[%s657_s1 + $0xd0] sm:$0xff]  ;;  %v57_v32 = vld [vmem:[%s657_s1 + $0xd8] sm:$0xff]  ;;  %v417_v33 = vpack.c.bf16 %v39_v30, %v38_v29  ;;  %v58_v37 = vld [vmem:[%s657_s1 + $0xe0] sm:$0xff]  ;;  %391 = vmatprep.mubr.msk.f32.mxu1 %vm471_vm0, %v470_v58  ;;  %vm154_vm2 = vcmask 326656   ;;  %vm234_vm4 = vcmask 162816   ;;  %v233_v9 = vstv %s662_s6 }
   0xd   :  { %410 = vmatpush3.bf16.msra.mxu0 %v409_v20  ;;  %v419_v34 = vpack.c.bf16 %v57_v32, %v56_v31  ;;  %v40_v35 = vld [vmem:[%s657_s1 + $0x50] sm:$0xff]  ;;  %v41_v36 = vld [vmem:[%s657_s1 + $0x58] sm:$0xff]  ;;  %v59_v38 = vld [vmem:[%s657_s1 + $0xe8] sm:$0xff]  ;;  %vm317_vm5 = vcmask 57344  }
   0xe   :  { %412 = vmatprep.subr.bf16.mxu0 %v411_v21  ;;  %v421_v39 = vpack.c.bf16 %v41_v36, %v40_v35  ;;  %v423_v40 = vpack.c.bf16 %v59_v38, %v58_v37  ;;  %v42_v41 = vld [vmem:[%s657_s1 + $0x60] sm:$0xff]  ;;  %v43_v42 = vld [vmem:[%s657_s1 + $0x68] sm:$0xff]  ;;  %v60_v43 = vld [vmem:[%s657_s1 + $0xf0] sm:$0xff] }
   0xf   :  { %v61_v44 = vld [vmem:[%s657_s1 + $0xf8] sm:$0xff]  ;;  %v425_v45 = vpack.c.bf16 %v43_v42, %v42_v41  ;;  %v44_v47 = vld [vmem:[%s657_s1 + $0x70] sm:$0xff]  ;;  %v28_v50 = vld [vmem:[%s656_s0] sm:$0xff] }
  0x10   :  { %v427_v46 = vpack.c.bf16 %v61_v44, %v60_v43  ;;  %v45_v48 = vld [vmem:[%s657_s1 + $0x78] sm:$0xff]  ;;  %v142_v51 = vld [vmem:[%s659_s3] sm:$0xff]  ;;  %v143_v52 = vld [vmem:[%s659_s3 + $0x8] sm:$0xff] }
  0x11   :  { %414 = vmatpush3.bf16.msra.mxu0 %v413_v27  ;;  %v429_v49 = vpack.c.bf16 %v45_v48, %v44_v47  ;;  %v432_v53 = vpack.c.bf16 %v143_v52, %v142_v51  ;;  %v144_v54 = vld [vmem:[%s659_s3 + $0x10] sm:$0xff]  ;;  %v145_v55 = vld [vmem:[%s659_s3 + $0x18] sm:$0xff]  ;;  %v146_v57 = vld [vmem:[%s659_s3 + $0x20] sm:$0xff] }
  0x12   :  { %416 = vmatprep.subr.bf16.mxu0 %v415_v28  ;;  %v435_v56 = vpack.c.bf16 %v145_v55, %v144_v54  ;;  %v333_v60 = vld [vmem:[%s658_s2] ss:$0 sm:$0xff] }
  0x13   :  { %433 = vmatpush3.bf16.msra.mxu1 %v432_v53  ;;  %v334_v2 = vld [vmem:[%s660_s4] ss:$0 sm:$0xff]  ;;  %s472_s4 = smov [#allocation3]  }
  0x14   :  { %434 = vmatprep.subr.bf16.mxu1 %v469_v7  ;;  %v231_v8 = vld [vmem:[%s661_s5] sm:$0x1]  ;;  %s325_s14 = sshll.u32 %s472_s4, 4  ;;  %s326_s14 = int_to_ptr.vmem [resolvable:$true] %s325_s14 }
  0x15   :  { %418 = vmatpush3.bf16.msra.mxu0 %v417_v33  ;;  %s445_s5 = scalar_lea.vmem %s326_s14, 16  ;;  %s449_s15 = scalar_lea.vmem %s326_s14, 32 }
  0x16   :  { %420 = vmatprep.subr.bf16.mxu0 %v419_v34  ;;  %p446_p0 = scmp.ne.s32.totalorder %s326_s14, %s445_s5  ;;  %p450_p1 = scmp.lt.s32.totalorder %s326_s14, %s326_s14 }
  0x17   :  { %436 = vmatpush3.bf16.msra.mxu1 %v435_v56  ;;  %p451_p2 = scmp.lt.s32.totalorder %s449_s15, %s445_s5 }
  0x18   :  { %389 = vmatprep.subr.mxu1 %v470_v58 }
  0x19   :  { %422 = vmatpush3.bf16.msra.mxu0 %v421_v39  ;;  %p452_p3 = por %p451_p2, %p450_p1 }
  0x1a   :  { %424 = vmatprep.subr.bf16.mxu0 %v423_v40 }
  0x1b   :  { %390 = vmatpush3.msra.mxu1 %v146_v57  ;;  %p453_p4 = pnand %p452_p3, %p446_p0 }
  0x1c   :  { %394 = vmatprep.subr.mxu1 %v470_v58 }
  0x1d   :  { %426 = vmatpush3.bf16.msra.mxu0 %v425_v45 }
  0x1e   :  { %428 = vmatprep.subr.bf16.mxu0 %v427_v46 }
  0x21   :  { %430 = vmatpush3.bf16.msra.mxu0 %v429_v49 }
  0x24   :  { %134 = vmatmul.mubr.f32.vlgmr.msra.gmra.mrb[0].mxu0 %v28_v50 }
  0xf7   :  { %v370_v59 = vpop.f32.mrb[0].mxu0 }
  0xf8   :  { %v371_v61 = vpop.f32.mrb[1].mxu0 }
  0xf9   :  { %v372_v62 = vadd.f32 %v371_v61, %v370_v59 }
  0xfb   :  { %v136_v63 = vadd.f32 %v372_v62, %v333_v60 }
  0xfd   :  { %v140_v0 = vmul.f32 0.2, %v136_v63  ;;  %vm139_vm1 = vcmp.gt.f32.partialorder %v136_v63, 0.0 }
  0xff   :  { %v141_v1 = vsel %vm139_vm1, %v136_v63, %v140_v0 }
 0x100   :  { %392 = vmatmul.mubr.msk.f32.vlgmr.msra.gmra.mrb[0].mxu1 %vm154_vm2, %v141_v1 }
 0x101   :  { %396 = vmatprep.mubr.msk.f32.mxu1 %vm471_vm0, %v470_v58 }
 0x1d3   :  { %v224_v3 = vpop.f32.mrb[0].mxu1 }
 0x1d4   :  { %v225_v4 = vadd.f32 %v334_v2, %v224_v3  ;;  %v393_v5 = vpop.f32.mrb[1].mxu1 }
 0x1d6   :  { %vm228_vm3 = vcmp.gt.f32.partialorder %v225_v4, 0.0  ;;  %v229_v6 = vmul.f32 0.2, %v225_v4 }
 0x1d8   :  { %v230_v7 = vsel %vm228_vm3, %v225_v4, %v229_v6 }
 0x1d9   :  { %395 = vmatpush3.xpose.msk.msra.mxu1 %vm234_vm4, %v230_v7 }
 0x1dc   :  { %397 = vmatmul.mubr.msk.f32.vlgmr.msra.gmra.mrb[2].mxu1 %vm234_vm4, %v231_v8 }
 0x2af   :  { %v307_v10 = vpop.f32.mrb[2].mxu1 }
 0x2b0   :  { %v308_v11 = vadd.f32 %v307_v10, %v233_v9  ;;  %v398_v12 = vpop.f32.mrb[3].mxu1 }
 0x2b2   :  { %v311_v13 = vsub.f32 0.0, %v308_v11 }
 0x2b4   :  { %v312_v14 = vmul.f32 1.442695, %v311_v13 }
 0x2b6   :  { %441 = vpow2.f32 %v312_v14 }
 0x2c0   :  { %v442_v15 = vpop.eup %441 }
 0x2c1   :  { %v314_v16 = vadd.f32 1.0, %v442_v15 }
 0x2c3   :  { %443 = vrcp.f32 %v314_v16 }
 0x2cd   :  { %v444_v17 = vpop.eup %443 }
 0x2ce   :  { %318 = vst.msk [vmem:[#allocation3] sm:$0x1] %vm317_vm5, %v444_v17 }
 0x2cf   :  { %456 = shalt.err (!%p453_p4)
}
 0x2d0   :  { %s457_s17 = scalar_lea.hbm %s663_s7, 16 }
 0x2d1   :  { %p458_p5 = scmp.ne.s32.totalorder %s663_s7, %s457_s17  ;;  %p461_p6 = scmp.lt.u32.totalorder %s457_s17, %s663_s7 }
 0x2d3   :  { %p463_p7 = pnand %p461_p6, %p458_p5 }
 0x2d5   :  { %466 = shalt.err (!%p463_p7)
}
 0x2d6   :  { %328 = dma.vmem_to_hbm [thread:$0]  %s326_s14, 16, %s663_s7, [#allocation4]  }
 0x2d7   :  { %467 = dma.done.wait [#allocation4], 16  }
 0x2d8   :  { %468 = vsyncadd [#allocation4], 4294967280 }
 0x2d9   :  { %332 = vsyncpa [#allocation4], 1 }

</bundles_post_ra>
